<compile_context>
chip_gen: v7x
topology: tpu7x:2x2x1
jax: 0.10.0
libtpu: 0.0.40
codegen_flags: <defaults>
</compile_context>

<pallas_src>
import jax
import jax.numpy as jnp
from jax.experimental import pallas as pl
from jax.experimental.pallas import tpu as pltpu


def _round_up(x, m):
    return ((x + m - 1) // m) * m


def _mlp_kernel(x_ref,
                w1_ref, b1_ref,
                w2_ref, b2_ref,
                w3_ref, b3_ref,
                w4_ref, b4_ref,
                wo_ref, bo_ref,
                out_ref):
    # x_ref: (9, bb) bf16, batch on lanes.  All weights bf16, biases f32.
    # Fused 5-layer MLP; every dot accumulates in f32 on the MXU, ReLU on the
    # VPU over lane-dense (out, bb) tiles, re-cast to bf16 for the next dot.
    x = x_ref[...]                                                     # (9, bb) bf16

    h = jnp.dot(w1_ref[...], x, preferred_element_type=jnp.float32) + b1_ref[...]
    h = jnp.maximum(h, 0.0).astype(jnp.bfloat16)                       # (4, bb)

    h = jnp.dot(w2_ref[...], h, preferred_element_type=jnp.float32) + b2_ref[...]
    h = jnp.maximum(h, 0.0).astype(jnp.bfloat16)                       # (8, bb)

    h = jnp.dot(w3_ref[...], h, preferred_element_type=jnp.float32) + b3_ref[...]
    h = jnp.maximum(h, 0.0).astype(jnp.bfloat16)                       # (16, bb)

    h = jnp.dot(w4_ref[...], h, preferred_element_type=jnp.float32) + b4_ref[...]
    h = jnp.maximum(h, 0.0).astype(jnp.bfloat16)                       # (32, bb)

    out = jnp.dot(wo_ref[...], h, preferred_element_type=jnp.float32) + bo_ref[...]
    out_ref[...] = out.astype(out_ref.dtype)                           # (1, bb) f32


def binary_classifier_forward(x, params, *, block_batch=8192):
    """x: (B, 9) float32.  Returns (B, 1) float32 (same semantics as PyTorch).

    params: weights as (out, in) bf16, biases as (out, 1) f32.
    block_batch: batch tile size (lanes); rounded to a multiple of 128 and
    clamped to the (padded) batch.  Sweep 2048-8192 for large batches.
    """
    B, F = x.shape
    assert F == 9

    # Lane-dense tiling: block must be a multiple of 128 on the lane axis.
    bb = int(min(block_batch, _round_up(B, 128)))
    bb = _round_up(bb, 128)
    Bp = _round_up(B, bb)
    grid = (Bp // bb,)

    # Transpose + cast + pad in the wrapper (single XLA fusion): kernel sees
    # a (9, Bp) bf16 slab with batch on the lane axis.
    xt = x.T.astype(jnp.bfloat16)
    if Bp != B:
        xt = jnp.pad(xt, ((0, 0), (0, Bp - B)))

    # Weights/biases are tiny full-array blocks with a constant index_map, so
    # they are DMA'd into VMEM once and stay resident across the grid.
    def rep(shape):
        return pl.BlockSpec(shape, lambda i: (0, 0))

    in_specs = [
        pl.BlockSpec((9, bb), lambda i: (0, i)),   # x (batch tiled on lanes)
        rep((4, 9)),  rep((4, 1)),                 # layer_1
        rep((8, 4)),  rep((8, 1)),                 # layer_2
        rep((16, 8)), rep((16, 1)),                # layer_3
        rep((32, 16)), rep((32, 1)),               # layer_4
        rep((1, 32)), rep((1, 1)),                 # layer_out
    ]
    out_spec = pl.BlockSpec((1, bb), lambda i: (0, i))

    out = pl.pallas_call(
        _mlp_kernel,
        out_shape=jax.ShapeDtypeStruct((1, Bp), jnp.float32),
        grid_spec=pltpu.PrefetchScalarGridSpec(
            num_scalar_prefetch=0,
            grid=grid,
            in_specs=in_specs,
            out_specs=out_spec,
        ),
        compiler_params=pltpu.CompilerParams(
            dimension_semantics=("parallel",),   # shard batch tiles across TCs (v7x)
        ),
    )(
        xt,
        params["w1"], params["b1"],
        params["w2"], params["b2"],
        params["w3"], params["b3"],
        params["w4"], params["b4"],
        params["wo"], params["bo"],
    )
    # (1, Bp) -> (B, 1) to match the PyTorch module's output shape.
    return out[0, :B][:, None]


def init_params(key, weight_dtype=jnp.bfloat16):
    """PyTorch Linear default init U(-1/sqrt(in), 1/sqrt(in)).
    Weights stored (out_features, in_features) in bf16 (MXU-native);
    biases (out_features, 1) in f32 (added after f32 accumulation)."""
    dims = [(4, 9), (8, 4), (16, 8), (32, 16), (1, 32)]   # (out, in)
    names = ["1", "2", "3", "4", "o"]
    params = {}
    for (fout, fin), n in zip(dims, names):
        key, kw, kb = jax.random.split(key, 3)
        bound = 1.0 / float(fin) ** 0.5
        w = jax.random.uniform(kw, (fout, fin), jnp.float32, minval=-bound, maxval=bound)
        b = jax.random.uniform(kb, (fout, 1), jnp.float32, minval=-bound, maxval=bound)
        params[f"w{n}"] = w.astype(weight_dtype)
        params[f"b{n}"] = b
    return params


def reference_forward(x, params):
    """Pure-JAX f32 reference (weights upcast from bf16)."""
    h = x
    for n in ["1", "2", "3", "4"]:
        w = params[f"w{n}"].astype(jnp.float32)
        b = params[f"b{n}"][:, 0]
        h = jnp.maximum(h @ w.T + b, 0.0)
    w = params["wo"].astype(jnp.float32)
    b = params["bo"][:, 0]
    return h @ w.T + b


if __name__ == "__main__":
    key = jax.random.PRNGKey(0)
    kp, kx = jax.random.split(key)
    params = init_params(kp)

    batch = 2048
    x = jax.random.normal(kx, (batch, 9), jnp.float32)

    # block_batch=512 -> grid=(4,) even at this small demo batch (pipelining +
    # both v7x TensorCores); for large batches leave the 8192 default and sweep.
    out = binary_classifier_forward(x, params, block_batch=512)
    out = jax.block_until_ready(out)

    ref = reference_forward(x, params)
    assert out.shape == (batch, 1)
    # bf16 operands at the MXU => looser tolerance vs the f32 reference.
    assert jnp.allclose(out, ref, atol=5e-2, rtol=5e-2), (
        float(jnp.max(jnp.abs(out - ref))))

    print("KERNEL_OK")
</pallas_src>

<mosaic_0001>
module attributes {stable_mosaic.version = 11 : i64} {
  func.func @_mlp_kernel(%arg0: i32, %arg1: memref<9x512xbf16, #tpu.memory_space<vmem>>, %arg2: memref<4x9xbf16, #tpu.memory_space<vmem>>, %arg3: memref<4x1xf32, #tpu.memory_space<vmem>>, %arg4: memref<8x4xbf16, #tpu.memory_space<vmem>>, %arg5: memref<8x1xf32, #tpu.memory_space<vmem>>, %arg6: memref<16x8xbf16, #tpu.memory_space<vmem>>, %arg7: memref<16x1xf32, #tpu.memory_space<vmem>>, %arg8: memref<32x16xbf16, #tpu.memory_space<vmem>>, %arg9: memref<32x1xf32, #tpu.memory_space<vmem>>, %arg10: memref<1x32xbf16, #tpu.memory_space<vmem>>, %arg11: memref<1x1xf32, #tpu.memory_space<vmem>>, %arg12: memref<1x512xf32, #tpu.memory_space<vmem>>) attributes {dimension_semantics = [#tpu.dimension_semantics<parallel>], iteration_bounds = array<i64: 4>, scalar_prefetch = 0 : i64, scratch_operands = 0 : i64, tpu.core_type = #tpu.core_type<tc>, window_params = [{transform_indices = @transform_0, window_bounds = array<i64: 9, 512>}, {pipeline_mode = #tpu.pipeline_mode<synchronous>, transform_indices = @transform_1, window_bounds = array<i64: 4, 9>}, {pipeline_mode = #tpu.pipeline_mode<synchronous>, transform_indices = @transform_2, window_bounds = array<i64: 4, 1>}, {pipeline_mode = #tpu.pipeline_mode<synchronous>, transform_indices = @transform_3, window_bounds = array<i64: 8, 4>}, {pipeline_mode = #tpu.pipeline_mode<synchronous>, transform_indices = @transform_4, window_bounds = array<i64: 8, 1>}, {pipeline_mode = #tpu.pipeline_mode<synchronous>, transform_indices = @transform_5, window_bounds = array<i64: 16, 8>}, {pipeline_mode = #tpu.pipeline_mode<synchronous>, transform_indices = @transform_6, window_bounds = array<i64: 16, 1>}, {pipeline_mode = #tpu.pipeline_mode<synchronous>, transform_indices = @transform_7, window_bounds = array<i64: 32, 16>}, {pipeline_mode = #tpu.pipeline_mode<synchronous>, transform_indices = @transform_8, window_bounds = array<i64: 32, 1>}, {pipeline_mode = #tpu.pipeline_mode<synchronous>, transform_indices = @transform_9, window_bounds = array<i64: 1, 32>}, {pipeline_mode = #tpu.pipeline_mode<synchronous>, transform_indices = @transform_10, window_bounds = array<i64: 1, 1>}, {transform_indices = @transform_11, window_bounds = array<i64: 1, 512>}]} {
    %c0 = arith.constant 0 : index
    %c0_0 = arith.constant 0 : index
    %0 = vector.load %arg1[%c0, %c0_0] : memref<9x512xbf16, #tpu.memory_space<vmem>>, vector<9x512xbf16>
    %c0_1 = arith.constant 0 : index
    %c0_2 = arith.constant 0 : index
    %1 = vector.load %arg2[%c0_1, %c0_2] : memref<4x9xbf16, #tpu.memory_space<vmem>>, vector<4x9xbf16>
    %cst = arith.constant dense<0.000000e+00> : vector<4x512xf32>
    %2 = tpu.matmul %1, %0, %cst {dimension_numbers = #tpu.dot_dimension_numbers<[1], [0], [0], [1], [0, 0, 1, 1], [], []>} : vector<4x9xbf16>, vector<9x512xbf16>, vector<4x512xf32> -> vector<4x512xf32>
    %c0_3 = arith.constant 0 : index
    %c0_4 = arith.constant 0 : index
    %3 = vector.load %arg3[%c0_3, %c0_4] : memref<4x1xf32, #tpu.memory_space<vmem>>, vector<4x1xf32>
    %4 = vector.broadcast %3 : vector<4x1xf32> to vector<4x512xf32>
    %5 = arith.addf %2, %4 : vector<4x512xf32>
    %cst_5 = arith.constant 0.000000e+00 : f32
    %6 = vector.broadcast %cst_5 : f32 to vector<4x512xf32>
    %7 = arith.maximumf %5, %6 : vector<4x512xf32>
    %8 = arith.truncf %7 : vector<4x512xf32> to vector<4x512xbf16>
    %c0_6 = arith.constant 0 : index
    %c0_7 = arith.constant 0 : index
    %9 = vector.load %arg4[%c0_6, %c0_7] : memref<8x4xbf16, #tpu.memory_space<vmem>>, vector<8x4xbf16>
    %cst_8 = arith.constant dense<0.000000e+00> : vector<8x512xf32>
    %10 = tpu.matmul %9, %8, %cst_8 {dimension_numbers = #tpu.dot_dimension_numbers<[1], [0], [0], [1], [0, 0, 1, 1], [], []>} : vector<8x4xbf16>, vector<4x512xbf16>, vector<8x512xf32> -> vector<8x512xf32>
    %c0_9 = arith.constant 0 : index
    %c0_10 = arith.constant 0 : index
    %11 = vector.load %arg5[%c0_9, %c0_10] : memref<8x1xf32, #tpu.memory_space<vmem>>, vector<8x1xf32>
    %12 = vector.broadcast %11 : vector<8x1xf32> to vector<8x512xf32>
    %13 = arith.addf %10, %12 : vector<8x512xf32>
    %cst_11 = arith.constant 0.000000e+00 : f32
    %14 = vector.broadcast %cst_11 : f32 to vector<8x512xf32>
    %15 = arith.maximumf %13, %14 : vector<8x512xf32>
    %16 = arith.truncf %15 : vector<8x512xf32> to vector<8x512xbf16>
    %c0_12 = arith.constant 0 : index
    %c0_13 = arith.constant 0 : index
    %17 = vector.load %arg6[%c0_12, %c0_13] : memref<16x8xbf16, #tpu.memory_space<vmem>>, vector<16x8xbf16>
    %cst_14 = arith.constant dense<0.000000e+00> : vector<16x512xf32>
    %18 = tpu.matmul %17, %16, %cst_14 {dimension_numbers = #tpu.dot_dimension_numbers<[1], [0], [0], [1], [0, 0, 1, 1], [], []>} : vector<16x8xbf16>, vector<8x512xbf16>, vector<16x512xf32> -> vector<16x512xf32>
    %c0_15 = arith.constant 0 : index
    %c0_16 = arith.constant 0 : index
    %19 = vector.load %arg7[%c0_15, %c0_16] : memref<16x1xf32, #tpu.memory_space<vmem>>, vector<16x1xf32>
    %20 = vector.broadcast %19 : vector<16x1xf32> to vector<16x512xf32>
    %21 = arith.addf %18, %20 : vector<16x512xf32>
    %cst_17 = arith.constant 0.000000e+00 : f32
    %22 = vector.broadcast %cst_17 : f32 to vector<16x512xf32>
    %23 = arith.maximumf %21, %22 : vector<16x512xf32>
    %24 = arith.truncf %23 : vector<16x512xf32> to vector<16x512xbf16>
    %c0_18 = arith.constant 0 : index
    %c0_19 = arith.constant 0 : index
    %25 = vector.load %arg8[%c0_18, %c0_19] : memref<32x16xbf16, #tpu.memory_space<vmem>>, vector<32x16xbf16>
    %cst_20 = arith.constant dense<0.000000e+00> : vector<32x512xf32>
    %26 = tpu.matmul %25, %24, %cst_20 {dimension_numbers = #tpu.dot_dimension_numbers<[1], [0], [0], [1], [0, 0, 1, 1], [], []>} : vector<32x16xbf16>, vector<16x512xbf16>, vector<32x512xf32> -> vector<32x512xf32>
    %c0_21 = arith.constant 0 : index
    %c0_22 = arith.constant 0 : index
    %27 = vector.load %arg9[%c0_21, %c0_22] : memref<32x1xf32, #tpu.memory_space<vmem>>, vector<32x1xf32>
    %28 = vector.broadcast %27 : vector<32x1xf32> to vector<32x512xf32>
    %29 = arith.addf %26, %28 : vector<32x512xf32>
    %cst_23 = arith.constant 0.000000e+00 : f32
    %30 = vector.broadcast %cst_23 : f32 to vector<32x512xf32>
    %31 = arith.maximumf %29, %30 : vector<32x512xf32>
    %32 = arith.truncf %31 : vector<32x512xf32> to vector<32x512xbf16>
    %c0_24 = arith.constant 0 : index
    %c0_25 = arith.constant 0 : index
    %33 = vector.load %arg10[%c0_24, %c0_25] : memref<1x32xbf16, #tpu.memory_space<vmem>>, vector<1x32xbf16>
    %cst_26 = arith.constant dense<0.000000e+00> : vector<1x512xf32>
    %34 = tpu.matmul %33, %32, %cst_26 {dimension_numbers = #tpu.dot_dimension_numbers<[1], [0], [0], [1], [0, 0, 1, 1], [], []>} : vector<1x32xbf16>, vector<32x512xbf16>, vector<1x512xf32> -> vector<1x512xf32>
    %c0_27 = arith.constant 0 : index
    %c0_28 = arith.constant 0 : index
    %35 = vector.load %arg11[%c0_27, %c0_28] : memref<1x1xf32, #tpu.memory_space<vmem>>, vector<1x1xf32>
    %36 = vector.broadcast %35 : vector<1x1xf32> to vector<1x512xf32>
    %37 = arith.addf %34, %36 : vector<1x512xf32>
    %c0_29 = arith.constant 0 : index
    %c0_30 = arith.constant 0 : index
    %38 = vector.load %arg12[%c0_29, %c0_30] : memref<1x512xf32, #tpu.memory_space<vmem>>, vector<1x512xf32>
    tpu.vector_store %arg12[%c0_29, %c0_30], %37 {strides = array<i32>} : memref<1x512xf32, #tpu.memory_space<vmem>>, vector<1x512xf32>,
    return
  }
  func.func @transform_0(%arg0: i32) -> (i32, i32) {
    %c0_i32 = arith.constant 0 : i32
    %c0_i32_0 = arith.constant 0 : i32
    return %c0_i32, %arg0 : i32, i32
  }
  func.func @transform_1(%arg0: i32) -> (i32, i32) {
    %c0_i32 = arith.constant 0 : i32
    %c0_i32_0 = arith.constant 0 : i32
    %c0_i32_1 = arith.constant 0 : i32
    return %c0_i32, %c0_i32_0 : i32, i32
  }
  func.func @transform_2(%arg0: i32) -> (i32, i32) {
    %c0_i32 = arith.constant 0 : i32
    %c0_i32_0 = arith.constant 0 : i32
    %c0_i32_1 = arith.constant 0 : i32
    return %c0_i32, %c0_i32_0 : i32, i32
  }
  func.func @transform_3(%arg0: i32) -> (i32, i32) {
    %c0_i32 = arith.constant 0 : i32
    %c0_i32_0 = arith.constant 0 : i32
    %c0_i32_1 = arith.constant 0 : i32
    return %c0_i32, %c0_i32_0 : i32, i32
  }
  func.func @transform_4(%arg0: i32) -> (i32, i32) {
    %c0_i32 = arith.constant 0 : i32
    %c0_i32_0 = arith.constant 0 : i32
    %c0_i32_1 = arith.constant 0 : i32
    return %c0_i32, %c0_i32_0 : i32, i32
  }
  func.func @transform_5(%arg0: i32) -> (i32, i32) {
    %c0_i32 = arith.constant 0 : i32
    %c0_i32_0 = arith.constant 0 : i32
    %c0_i32_1 = arith.constant 0 : i32
    return %c0_i32, %c0_i32_0 : i32, i32
  }
  func.func @transform_6(%arg0: i32) -> (i32, i32) {
    %c0_i32 = arith.constant 0 : i32
    %c0_i32_0 = arith.constant 0 : i32
    %c0_i32_1 = arith.constant 0 : i32
    return %c0_i32, %c0_i32_0 : i32, i32
  }
  func.func @transform_7(%arg0: i32) -> (i32, i32) {
    %c0_i32 = arith.constant 0 : i32
    %c0_i32_0 = arith.constant 0 : i32
    %c0_i32_1 = arith.constant 0 : i32
    return %c0_i32, %c0_i32_0 : i32, i32
  }
  func.func @transform_8(%arg0: i32) -> (i32, i32) {
    %c0_i32 = arith.constant 0 : i32
    %c0_i32_0 = arith.constant 0 : i32
    %c0_i32_1 = arith.constant 0 : i32
    return %c0_i32, %c0_i32_0 : i32, i32
  }
  func.func @transform_9(%arg0: i32) -> (i32, i32) {
    %c0_i32 = arith.constant 0 : i32
    %c0_i32_0 = arith.constant 0 : i32
    %c0_i32_1 = arith.constant 0 : i32
    return %c0_i32, %c0_i32_0 : i32, i32
  }
  func.func @transform_10(%arg0: i32) -> (i32, i32) {
    %c0_i32 = arith.constant 0 : i32
    %c0_i32_0 = arith.constant 0 : i32
    %c0_i32_1 = arith.constant 0 : i32
    return %c0_i32, %c0_i32_0 : i32, i32
  }
  func.func @transform_11(%arg0: i32) -> (i32, i32) {
    %c0_i32 = arith.constant 0 : i32
    %c0_i32_0 = arith.constant 0 : i32
    return %c0_i32, %arg0 : i32, i32
  }
}

</mosaic_0001>

<bundles_post_ra>
// kernel: tpu_custom_call.1
= control target key start
LH: loop header
LB: loop body
LE: loop exit
PB: predicated region body
PF: predicated region fallthrough
CT: control target
= control target key end

     0   :  { %s1678_s0 = inlined_call_operand.hbm [shape: bf16[9,2048], index: 0, kind: input, shape index: {}]   ;;  %s1679_s1 = inlined_call_operand.vmem [shape: bf16[4,9], index: 1, kind: input, shape index: {}]   ;;  %s1680_s2 = inlined_call_operand.vmem [shape: f32[4,1], index: 2, kind: input, shape index: {}]   ;;  %s1681_s3 = inlined_call_operand.vmem [shape: bf16[8,4], index: 3, kind: input, shape index: {}]   ;;  %s1682_s4 = inlined_call_operand.vmem [shape: f32[8,1], index: 4, kind: input, shape index: {}]   ;;  %s1683_s5 = inlined_call_operand.vmem [shape: bf16[16,8], index: 5, kind: input, shape index: {}]   ;;  %s1684_s6 = inlined_call_operand.vmem [shape: f32[16,1], index: 6, kind: input, shape index: {}]   ;;  %s1685_s7 = inlined_call_operand.vmem [shape: bf16[32,16], index: 7, kind: input, shape index: {}]   ;;  %s1686_s8 = inlined_call_operand.vmem [shape: f32[32,1], index: 8, kind: input, shape index: {}]   ;;  %s1687_s9 = inlined_call_operand.vmem [shape: bf16[1,32], index: 9, kind: input, shape index: {}]   ;;  %s1688_s10 = inlined_call_operand.<no memory space> [shape: f32[1,1], index: 10, kind: input, shape index: {}]   ;;  %s1689_s11 = inlined_call_operand.hbm [shape: f32[1,2048], index: 11, kind: output, shape index: {}]  }
   0x1   :  { %v16_v0 = vstv %s1688_s10 }
   0x2   :  { %17 = vst [vmem:[#allocation2] sm:$0x1] %v16_v0 }
   0x3   :  { %18 = vsyncpa [#allocation4], 0 }
   0x4   :  { %20 = vsyncpa [#allocation4 + $0x1], 0 }
   0x5   :  { %21 = vsyncpa [#allocation5], 0 }
   0x6   :  { %23 = vsyncpa [#allocation5 + $0x1], 0  ;;  %s1456_s19 = smov 0   ;;  %s1458_s20 = smov 0  }
   0x7   :  { %s1460_s21 = smov 0   ;;  %s1462_s22 = smov 0  }
   0x8 LB: > { %s1477_s10 = sadd.s32 4294967295, %s1383_s22   ;;  %s1185_s23 = sadd.s32 4294967294, %s1383_s22   ;;  %s1383_s22 = sphi %s1462_s22, %s1704_s22   ;;  %s1379_s21 = sphi %s1460_s21, %s1703_s21   ;;  %s1375_s20 = sphi %s1458_s20, %s1702_s20   ;;  %s1371_s19 = sphi %s1456_s19, %s1701_s19  }
   0x9   : > { %s1481_s24 = sadd.s32 1, %s1383_s22   ;;  %s36_s25 = sadd.s32 1, %s1379_s21 }
   0xa   : > { %s33_s26 = ssub.s32 %s1383_s22, %s1481_s24  ;;  %p43_p0 = scmp.ne.s32.totalorder %s1379_s21, %s1375_s20 }
   0xb   : > { %p34_p1 = scmp.eq.s32.totalorder %s33_s26, 0  ;;  %p44_p2 = scmp.eq.s32.totalorder %s1383_s22, 0 }
   0xc   : > { %p49_p3 = scmp.ne.s32.totalorder %s1375_s20, %s1371_s19  ;;  %p50_p4 = scmp.eq.s32.totalorder %s1477_s10, 0 }
   0xd   : > { %s1493_s27 = scalar_select %p34_p1, %s1379_s21, %s36_s25  }
   0xe   : > { %p1495_p5 = por %p44_p2, %p43_p0  ;;  %p1499_p6 = por %p50_p4, %p49_p3 }
   0xf   : > { %1691 = sst [smem:[#allocation9_spill]] %s1493_s27  ;;  %p283_p7 = scmp.eq.s32.totalorder %s1477_s10, 3 }
  0x10   : > { %p289_p8 = scmp.eq.s32.totalorder %s1185_s23, 3  ;;  %p1236_p9 = scmp.lt.s32.totalorder %s1383_s22, 4 }
  0x11   : > { %p1505_p10 = por %p283_p7, %p43_p0  ;;  %s339_s13 = sand.u32 1, %s1379_s21  }
  0x12   : > { %p1509_p11 = por %p289_p8, %p49_p3  ;;  %s1222_s14 = sshll.u32 %s1383_s22, 8 }
  0x13   : > { %s1694_s30 = scalar_select %p1505_p10, 1, 0 }
  0x14   : > { %s1695_s12 = scalar_select %p1509_p11, 1, 0 }
  0x15   : > { %s1188_s15 = sshll.u32 %s339_s13, 5  ;;  %s1518_s18 = scalar_lea.hbm %s1678_s0, %s1222_s14 }
  0x16   : > { %s343_s23 = scalar_lea.vmem [#allocation3], %s1188_s15  ;;  %p1522_p12 = pnand %p1236_p9, %p1495_p5 }
  0x17   : > { %s350_s25 = sshll.u32 %s343_s23, 4  ;;  %s1529_s27 = scalar_lea.sflag [#allocation4], %s339_s13  ;;  %s1526_s25 = int_to_ptr.vmem [resolvable:$true] %s350_s25 }
  0x18   : > { %s1287_s14 = scalar_lea.hbm %s1518_s18, 512  ;;  %p1289_p1 = pneg %p1522_p12 }
  0x19   : > { %p1288_p0 = scmp.ne.s32.totalorder %s1518_s18, %s1287_s14  ;;  %s1292_s16 = scalar_lea.hbm %s1678_s0, 2048 }
  0x1a   : > { %p1293_p4 = scmp.lt.u32.totalorder %s1518_s18, %s1678_s0  ;;  %p1294_p5 = scmp.lt.u32.totalorder %s1292_s16, %s1287_s14 }
  0x1b   : > { %p1290_p2 = pnand %p1289_p1, %p1288_p0  ;;  %p1296_p8 = scmp.lt.u32.totalorder %s1287_s14, %s1518_s18 }
  0x1c   : > { %p1295_p7 = por %p1294_p5, %p1293_p4 }
  0x1d   : > { %p1291_p3 = pneg %p1290_p2 }
  0x1e   : > { %p1297_p9 = por %p1296_p8, %p1295_p7 }
  0x20   : > { %p1298_p13 = pnand %p1297_p9, %p1291_p3 }
  0x22   : > { %1301 = shalt.err (!%p1298_p13)
}
  0x23   : > { %s1302_s13 = scalar_lea.vmem %s1526_s25, 512  ;;  %s1385_s28 = smov [#allocation3]  }
  0x24   : > { %p1303_p0 = scmp.ne.s32.totalorder %s1526_s25, %s1302_s13  ;;  %s1307_s15 = sshll.u32 %s1385_s28, 4  ;;  %s1308_s15 = int_to_ptr.vmem [resolvable:$false] %s1307_s15 }
  0x25   : > { %s1309_s17 = scalar_lea.vmem %s1308_s15, 1024  ;;  %p1310_p10 = scmp.lt.s32.totalorder %s1526_s25, %s1308_s15 }
  0x26   : > { %p1305_p2 = pnand %p1303_p0, %p1289_p1  ;;  %p1311_p4 = scmp.lt.s32.totalorder %s1309_s17, %s1302_s13 }
  0x28   : > { %p1306_p11 = pneg %p1305_p2  ;;  %p1312_p5 = por %p1311_p4, %p1310_p10 }
  0x2a   : > { %p1313_p7 = pnand %p1312_p5, %p1306_p11 }
  0x2c   : > { %1316 = shalt.err (!%p1313_p7)
}
  0x2d   : > { %s1386_s14 = smov 1024   ;;  %s1387_s16 = smov 256  }
  0x2e   : > { %s1388_s23 = smov 16   ;;  %p358_p13 = scmp.lt.s32.totalorder %s1383_s22, 5 }
  0x2f   : > { %1231 = dma.hbm_to_vmem [thread:$0]  (!%p1522_p12), %s1518_s18, 512, %s1526_s25, %s1529_s27, %s1386_s14, %s1387_s16, %s1388_s23  }
  0x30   : > { %p1697_p1 = scmp.ge.s32.totalorder %s1383_s22, 1 }
  0x32   : > { %p359_p3 = pnand %p1697_p1, %p358_p13 }
  0x33   : > { %s1561_s13 = sand.u32 (!%p359_p3), 1, %s1375_s20  }
  0x34   : > { %362 = sbr.rel (%p359_p3) target bundleno = 1210 (0x4ba), region = 64  ;;  %s1192_s28 = sshll.u32 (!%p359_p3), %s1561_s13, 5 }
  0x35   : > { %s365_s15 = scalar_lea.sflag (!%p359_p3), [#allocation4], %s1561_s13  ;;  %s368_s17 = scalar_lea.vmem (!%p359_p3), [#allocation3], %s1192_s28 }
  0x3b   : > { %1362 = dma.done.wait (%p1499_p6), %s365_s15, 512  }
  0x3c   : > { %1364 = vsyncadd (%p1499_p6), %s365_s15, 4294966784  ;;  %vm441_vm0 = vcmask 1043456   ;;  %v1389_v1 = vmov 0   ;;  %vm442_vm1 = vcmask 1044480   ;;  %v1390_v2 = vmov 65535   ;;  %v548_v15 = vld [vmem:[%s1682_s4] sm:$0xff] }
  0x3d   : > { %489 = vmatprep.mubr.bf16.mxu0 %v1389_v1  ;;  %530 = vmatprep.mubr.bf16.mxu1 %v1389_v1  ;;  %v443_v3 = vsel %vm441_vm0, 4294967295, %v1390_v2  ;;  %v1278_v5 = vld [vmem:[%s368_s17 + $0x4] ss:$16 sps:$4 sm:$0x1f]   ;;  %v415_v11 = vld [vmem:[%s1680_s2] sm:$0xf] }
  0x3e   : > { %1276 = vset.pattern.permute.xlu0 %v1389_v1  ;;  %1277 = vset.pattern.permute.xlu1 %v1389_v1  ;;  %v444_v4 = vsel %vm442_vm1, %v443_v3, 0  ;;  %v1280_v6 = vld [vmem:[%s368_s17 + $0xc] ss:$16 sps:$4 sm:$0x1f]   ;;  %v414_v14 = vld [vmem:[%s1679_s1] sm:$0x3] }
  0x3f   : > { %v449_v7 = vand.u32 %v1278_v5, %v444_v4  ;;  %v1282_v8 = vld [vmem:[%s368_s17] ss:$16 sps:$4 sm:$0x1f]   ;;  %v1283_v9 = vld [vmem:[%s368_s17 + $0x8] ss:$16 sps:$4 sm:$0x1f]   ;;  %v455_v10 = vand.u32 %v1280_v6, %v444_v4  ;;  %418 = vperm.xlu0 %1276, %v415_v11  }
  0x40   : > { %v446_v12 = vand.u32 %v1282_v8, %v444_v4  ;;  %v452_v13 = vand.u32 %v1283_v9, %v444_v4  ;;  %vm437_vm2 = vcmask 72704   ;;  %v798_v16 = vld [vmem:[%s1686_s8] sm:$0xff]  ;;  %v800_v17 = vld [vmem:[%s1686_s8 + $0x10] sm:$0xff]  ;;  %vm558_vm3 = vcmask 1041408   ;;  %v664_v44 = vld [vmem:[%s1684_s6 + $0x8] sm:$0xff]  ;;  %s1193_s16 = sshll.u32 %s1561_s13, 2 }
  0x41   : > { %457 = vmatprep.subr.bf16.mxu0 %v449_v7  ;;  %498 = vmatprep.subr.bf16.mxu1 %v455_v10  ;;  %v970_v18 = vld [vmem:[#allocation2] sm:$0x1]  ;;  %vm554_vm4 = vcmask 31744   ;;  %v799_v45 = vld [vmem:[%s1686_s8 + $0x8] sm:$0xff]  ;;  %v801_v46 = vld [vmem:[%s1686_s8 + $0x18] sm:$0xff]  ;;  %vm680_vm5 = vcmask 64512  }
  0x42   : > { %458 = vmatpush1.bf16.msra.mxu0 %v446_v12  ;;  %499 = vmatpush1.bf16.msra.mxu1 %v452_v13  ;;  %v547_v42 = vld [vmem:[%s1681_s3] sm:$0xf]  ;;  %vm832_vm6 = vcmask 130048   ;;  %vm980_vm7 = vcmask 261120   ;;  %s1223_s23 = sshll.u32 %s1477_s10, 6  ;;  %s406_s28 = scalar_lea.vmem [#allocation6], %s1193_s16 }
  0x43   : > { %551 = vperm.xlu0 %1276, %v548_v15   ;;  %v663_v43 = vld [vmem:[%s1684_s6] sm:$0xff]  ;;  %s1115_s15 = sshll.u32 %s406_s28, 4  ;;  %s1635_s29 = scalar_lea.hbm %s1689_s11, %s1223_s23  ;;  %s1637_s15 = int_to_ptr.vmem [resolvable:$true] %s1115_s15 }
  0x44   : > { %667 = vperm.xlu1 %1277, %v663_v43   ;;  %v1284_v7 = vld [vmem:[%s1683_s5] sm:$0xff]   ;;  %s1101_s18 = scalar_lea.sflag [#allocation5], %s1561_s13  ;;  %s1317_s25 = scalar_lea.vmem %s1637_s15, 64 }
  0x45   : > { %1198 = vmatmul.mubr.msk.bf16.vlgmr.msra.gmra.mrb[0].mxu0 %vm437_vm2, %v414_v14  ;;  %1199 = vmatmul.mubr.msk.bf16.vlgmr.msra.gmra.mrb[0].mxu1 %vm437_vm2, %v414_v14  ;;  %p1318_p6 = scmp.ne.s32.totalorder %s1637_s15, %s1317_s25  ;;  %p1698_p10 = scmp.ne.s32.totalorder %s1694_s30, 0 }
  0x46   : > { %603 = vmatprep.mubr.bf16.mxu0 %v1389_v1  ;;  %644 = vmatprep.mubr.bf16.mxu1 %v1389_v1  ;;  %s1392_s10 = smov [#allocation6]  }
  0x47   : > { %804 = vperm.xlu0 %1276, %v798_v16   ;;  %p1319_p11 = pnand %p1318_p6, %p1698_p10  ;;  %s1321_s26 = sshll.u32 %s1392_s10, 4  ;;  %s1322_s26 = int_to_ptr.vmem [resolvable:$false] %s1321_s26 }
  0x48   : > { %672 = vperm.xlu1 %1277, %v664_v44   ;;  %s1323_s14 = scalar_lea.vmem %s1322_s26, 128  ;;  %p1324_p8 = scmp.lt.s32.totalorder %s1637_s15, %s1322_s26 }
  0x49   : > { %p1320_p12 = pneg %p1319_p11  ;;  %p1325_p9 = scmp.lt.s32.totalorder %s1323_s14, %s1317_s25 }
  0x4b   : > { %814 = vperm.xlu0 %1276, %v800_v17   ;;  %p1326_p0 = por %p1325_p9, %p1324_p8 }
  0x4c   : > { %809 = vperm.xlu1 %1277, %v799_v45  }
  0x4d   : > { %p1327_p2 = pnand %p1326_p0, %p1320_p12 }
  0x4f   : > { %973 = vperm.xlu0 %1276, %v970_v18  }
  0x50   : > { %819 = vperm.xlu1 %1277, %v801_v46  }
  0xbe   : > { %v419_v19 = vpop.permute.xlu0 %418 }
  0xc2   : > { %v552_v47 = vpop.permute.xlu0 %551 }
  0xc3   : > { %v668_v8 = vpop.permute.xlu1 %667 }
  0xc7   : > { %v673_v9 = vpop.permute.xlu1 %672 }
 0x118   : > { %v491_v20 = vpop.f32.mrb[0].mxu0  ;;  %v532_v21 = vpop.f32.mrb[0].mxu1 }
 0x119   : > { %v492_v22 = vadd.f32 %v491_v20, %v419_v19  ;;  %v533_v23 = vadd.f32 %v532_v21, %v419_v19  ;;  %v493_v24 = vpop.f32.mrb[1].mxu0  ;;  %v534_v25 = vpop.f32.mrb[1].mxu1 }
 0x11a   : > { %v494_v26 = vadd.f32 %v493_v24, %v419_v19  ;;  %v535_v27 = vadd.f32 %v534_v25, %v419_v19  ;;  %v495_v28 = vpop.f32.mrb[2].mxu0  ;;  %v536_v29 = vpop.f32.mrb[2].mxu1 }
 0x11b   : > { %v539_v30 = vmax.f32 %v492_v22, 0.0  ;;  %v541_v31 = vmax.f32 %v533_v23, 0.0  ;;  %v496_v32 = vpop.f32.mrb[3].mxu0  ;;  %v537_v33 = vpop.f32.mrb[3].mxu1 }
 0x11c   : > { %v540_v34 = vmax.f32 %v494_v26, 0.0  ;;  %v542_v35 = vmax.f32 %v535_v27, 0.0 }
 0x11d   : > { %v543_v36 = vpack.c.bf16 %v539_v30, %v539_v30  ;;  %v545_v37 = vpack.c.bf16 %v541_v31, %v541_v31 }
 0x11e   : > { %v544_v38 = vpack.c.bf16 %v540_v34, %v540_v34  ;;  %v546_v39 = vpack.c.bf16 %v542_v35, %v542_v35 }
 0x11f   : > { %v560_v40 = vsel %vm558_vm3, %v543_v36, 0  ;;  %v566_v41 = vsel %vm558_vm3, %v545_v37, 0 }
 0x120   : > { %1200 = vmatprep.subr.msk.bf16.mxu0 %vm558_vm3, %v544_v38  ;;  %1202 = vmatprep.subr.msk.bf16.mxu1 %vm558_vm3, %v546_v39  ;;  %v1285_v38 = vld [vmem:[%s1685_s7] sm:$0xff]   ;;  %v1286_v39 = vld [vmem:[%s1685_s7 + $0x8] sm:$0xff]  }
 0x121   : > { %572 = vmatpush1.bf16.msra.mxu0 %v560_v40  ;;  %613 = vmatpush1.bf16.msra.mxu1 %v566_v41  ;;  %v805_v40 = vpop.permute.xlu0 %804  ;;  %v810_v41 = vpop.permute.xlu1 %809 }
 0x124   : > { %1201 = vmatmul.mubr.msk.bf16.vlgmr.msra.gmra.mrb[4].mxu0 %vm554_vm4, %v547_v42  ;;  %1203 = vmatmul.mubr.msk.bf16.vlgmr.msra.gmra.mrb[4].mxu1 %vm554_vm4, %v547_v42 }
 0x125   : > { %728 = vmatprep.mubr.bf16.mxu0 %v1389_v1  ;;  %771 = vmatprep.mubr.bf16.mxu1 %v1389_v1 }
 0x1f7   : > { %v605_v48 = vpop.f32.mrb[4].mxu0  ;;  %v646_v49 = vpop.f32.mrb[4].mxu1 }
 0x1f8   : > { %v606_v50 = vadd.f32 %v605_v48, %v552_v47  ;;  %v647_v51 = vadd.f32 %v646_v49, %v552_v47  ;;  %v607_v52 = vpop.f32.mrb[5].mxu0  ;;  %v648_v53 = vpop.f32.mrb[5].mxu1 }
 0x1f9   : > { %v608_v54 = vadd.f32 %v607_v52, %v552_v47  ;;  %v649_v55 = vadd.f32 %v648_v53, %v552_v47  ;;  %v609_v56 = vpop.f32.mrb[6].mxu0  ;;  %v650_v57 = vpop.f32.mrb[6].mxu1 }
 0x1fa   : > { %v653_v58 = vmax.f32 %v606_v50, 0.0  ;;  %v655_v59 = vmax.f32 %v647_v51, 0.0  ;;  %v610_v60 = vpop.f32.mrb[7].mxu0  ;;  %v651_v61 = vpop.f32.mrb[7].mxu1 }
 0x1fb   : > { %v654_v62 = vmax.f32 %v608_v54, 0.0  ;;  %v656_v63 = vmax.f32 %v649_v55, 0.0 }
 0x1fc   : > { %v657_v0 = vpack.c.bf16 %v653_v58, %v653_v58  ;;  %v659_v2 = vpack.c.bf16 %v655_v59, %v655_v59 }
 0x1fd   : > { %v658_v3 = vpack.c.bf16 %v654_v62, %v654_v62  ;;  %v660_v4 = vpack.c.bf16 %v656_v63, %v656_v63 }
 0x1fe   : > { %v685_v5 = vsel %vm441_vm0, %v657_v0, 0  ;;  %v691_v6 = vsel %vm441_vm0, %v659_v2, 0  ;;  %v815_v2 = vpop.permute.xlu0 %814 }
 0x1ff   : > { %1205 = vmatprep.subr.msk.bf16.mxu0 %vm441_vm0, %v658_v3  ;;  %1207 = vmatprep.subr.msk.bf16.mxu1 %vm441_vm0, %v660_v4  ;;  %v820_v3 = vpop.permute.xlu1 %819 }
 0x200   : > { %697 = vmatpush1.bf16.msra.mxu0 %v685_v5  ;;  %740 = vmatpush1.bf16.msra.mxu1 %v691_v6 }
 0x203   : > { %1206 = vmatmul.mubr.msk.bf16.vlgmr.msra.gmra.mrb[8].mxu0 %vm680_vm5, %v1284_v7  ;;  %1208 = vmatmul.mubr.msk.bf16.vlgmr.msra.gmra.mrb[8].mxu1 %vm680_vm5, %v1284_v7 }
 0x204   : > { %871 = vmatprep.mubr.bf16.mxu0 %v1389_v1  ;;  %924 = vmatprep.mubr.bf16.mxu1 %v1389_v1 }
 0x2d6   : > { %v730_v10 = vpop.f32.mrb[8].mxu0  ;;  %v773_v11 = vpop.f32.mrb[8].mxu1 }
 0x2d7   : > { %v731_v12 = vadd.f32 %v730_v10, %v668_v8  ;;  %v774_v13 = vadd.f32 %v773_v11, %v668_v8  ;;  %v732_v14 = vpop.f32.mrb[9].mxu0  ;;  %v775_v15 = vpop.f32.mrb[9].mxu1 }
 0x2d8   : > { %v733_v16 = vadd.f32 %v732_v14, %v668_v8  ;;  %v776_v17 = vadd.f32 %v775_v15, %v668_v8  ;;  %v734_v18 = vpop.f32.mrb[10].mxu0  ;;  %v777_v19 = vpop.f32.mrb[10].mxu1 }
 0x2d9   : > { %v735_v20 = vadd.f32 %v734_v18, %v673_v9  ;;  %v778_v21 = vadd.f32 %v777_v19, %v673_v9  ;;  %v736_v22 = vpop.f32.mrb[11].mxu0  ;;  %v779_v23 = vpop.f32.mrb[11].mxu1  ;;  %v782_v26 = vmax.f32 %v731_v12, 0.0  ;;  %v784_v27 = vmax.f32 %v774_v13, 0.0 }
 0x2da   : > { %v737_v24 = vadd.f32 %v736_v22, %v673_v9  ;;  %v780_v25 = vadd.f32 %v779_v23, %v673_v9  ;;  %v783_v30 = vmax.f32 %v733_v16, 0.0  ;;  %v785_v31 = vmax.f32 %v776_v17, 0.0 }
 0x2db   : > { %v786_v28 = vmax.f32 %v735_v20, 0.0  ;;  %v788_v29 = vmax.f32 %v778_v21, 0.0 }
 0x2dc   : > { %v787_v32 = vmax.f32 %v737_v24, 0.0  ;;  %v789_v33 = vmax.f32 %v780_v25, 0.0 }
 0x2dd   : > { %v790_v34 = vpack.c.bf16 %v786_v28, %v782_v26  ;;  %v792_v35 = vpack.c.bf16 %v788_v29, %v784_v27 }
 0x2de   : > { %v791_v36 = vpack.c.bf16 %v787_v32, %v783_v30  ;;  %v793_v37 = vpack.c.bf16 %v789_v33, %v785_v31 }
 0x2e0   : > { %839 = vmatprep.subr.bf16.mxu0 %v791_v36  ;;  %892 = vmatprep.subr.bf16.mxu1 %v793_v37  ;;  %v969_v36 = vld [vmem:[%s1687_s9] sm:$0x1]  ;;  %v976_v37 = vlaneseq }
 0x2e1   : > { %840 = vmatpush1.bf16.msra.mxu0 %v790_v34  ;;  %893 = vmatpush1.bf16.msra.mxu1 %v792_v35 }
 0x2e2   : > { %vm1097_vm8 = vcmp.lt.s32.totalorder %v976_v37, 512 }
 0x2e4   : > { %1211 = vmatmul.mubr.msk.bf16.vlgmr.msra.gmra.mrb[12].mxu0 %vm832_vm6, %v1285_v38  ;;  %1213 = vmatmul.mubr.msk.bf16.vlgmr.msra.gmra.mrb[12].mxu1 %vm832_vm6, %v1285_v38  ;;  %v977_v38 = vshrl.u32 %v976_v37, 7 }
 0x2e5   : > { %881 = vmatprep.mubr.bf16.mxu0 %v1389_v1  ;;  %934 = vmatprep.mubr.bf16.mxu1 %v1389_v1 }
 0x2ec   : > { %1212 = vmatmul.mubr.msk.bf16.gmra.mrb[16].mxu0 %vm832_vm6, %v1286_v39  ;;  %1214 = vmatmul.mubr.msk.bf16.gmra.mrb[16].mxu1 %vm832_vm6, %v1286_v39  ;;  %v1391_v39 = vmov 1966171168  }
 0x2ed   : > { %1016 = vmatprep.mubr.bf16.mxu0 %v1389_v1  ;;  %1057 = vmatprep.mubr.bf16.mxu1 %v1389_v1 }
 0x3b7   : > { %v873_v42 = vpop.f32.mrb[12].mxu0  ;;  %v926_v43 = vpop.f32.mrb[12].mxu1 }
 0x3b8   : > { %v874_v44 = vadd.f32 %v873_v42, %v805_v40  ;;  %v927_v45 = vadd.f32 %v926_v43, %v805_v40  ;;  %v875_v46 = vpop.f32.mrb[13].mxu0  ;;  %v928_v47 = vpop.f32.mrb[13].mxu1 }
 0x3b9   : > { %v876_v48 = vadd.f32 %v875_v46, %v805_v40  ;;  %v929_v49 = vadd.f32 %v928_v47, %v805_v40  ;;  %v877_v50 = vpop.f32.mrb[14].mxu0  ;;  %v930_v51 = vpop.f32.mrb[14].mxu1  ;;  %v1073_v40 = vunpack.c.l.s4 %v1391_v39 }
 0x3ba   : > { %v878_v52 = vadd.f32 %v877_v50, %v810_v41  ;;  %v931_v53 = vadd.f32 %v930_v51, %v810_v41  ;;  %v879_v54 = vpop.f32.mrb[15].mxu0  ;;  %v932_v55 = vpop.f32.mrb[15].mxu1  ;;  %v945_v58 = vmax.f32 %v874_v44, 0.0  ;;  %v947_v1 = vmax.f32 %v927_v45, 0.0 }
 0x3bb   : > { %v880_v56 = vadd.f32 %v879_v54, %v810_v41  ;;  %v933_v57 = vadd.f32 %v932_v55, %v810_v41  ;;  %v946_v61 = vmax.f32 %v876_v48, 0.0  ;;  %v948_v62 = vmax.f32 %v929_v49, 0.0  ;;  %v974_v42 = vpop.permute.xlu0 %973 }
 0x3bc   : > { %v949_v59 = vmax.f32 %v878_v52, 0.0  ;;  %v951_v60 = vmax.f32 %v931_v53, 0.0  ;;  %v978_v41 = vsub.s32 0, %v977_v38  ;;  %v1074_v43 = vunpack.c.0.s8 %v1073_v40 }
 0x3bd   : > { %v950_v63 = vmax.f32 %v880_v56, 0.0  ;;  %v952_v0 = vmax.f32 %v933_v57, 0.0 }
 0x3be   : > { %v961_v4 = vpack.c.bf16 %v949_v59, %v945_v58  ;;  %v963_v5 = vpack.c.bf16 %v951_v60, %v947_v1  ;;  %v979_v44 = vrot.slane %v974_v42, %v978_v41  ;;  %v1077_v51 = vsub.s32 %v1074_v43, %v977_v38 }
 0x3bf   : > { %v962_v6 = vpack.c.bf16 %v950_v63, %v946_v61  ;;  %v964_v7 = vpack.c.bf16 %v952_v0, %v948_v62  ;;  %v883_v8 = vpop.f32.mrb[16].mxu0  ;;  %v936_v9 = vpop.f32.mrb[16].mxu1 }
 0x3c0   : > { %v884_v10 = vadd.f32 %v883_v8, %v815_v2  ;;  %v937_v11 = vadd.f32 %v936_v9, %v815_v2  ;;  %v885_v12 = vpop.f32.mrb[17].mxu0  ;;  %v938_v13 = vpop.f32.mrb[17].mxu1 }
 0x3c1   : > { %v886_v14 = vadd.f32 %v885_v12, %v815_v2  ;;  %v939_v15 = vadd.f32 %v938_v13, %v815_v2  ;;  %v887_v16 = vpop.f32.mrb[18].mxu0  ;;  %v940_v17 = vpop.f32.mrb[18].mxu1  ;;  %984 = vmatprep.subr.bf16.mxu0 %v962_v6  ;;  %1025 = vmatprep.subr.bf16.mxu1 %v964_v7 }
 0x3c2   : > { %v888_v18 = vadd.f32 %v887_v16, %v820_v3  ;;  %v941_v19 = vadd.f32 %v940_v17, %v820_v3  ;;  %v889_v20 = vpop.f32.mrb[19].mxu0  ;;  %v942_v21 = vpop.f32.mrb[19].mxu1  ;;  %985 = vmatpush1.bf16.msra.mxu0 %v961_v4  ;;  %1026 = vmatpush1.bf16.msra.mxu1 %v963_v5  ;;  %v953_v24 = vmax.f32 %v884_v10, 0.0  ;;  %v955_v25 = vmax.f32 %v937_v11, 0.0 }
 0x3c3   : > { %v890_v22 = vadd.f32 %v889_v20, %v820_v3  ;;  %v943_v23 = vadd.f32 %v942_v21, %v820_v3  ;;  %v954_v28 = vmax.f32 %v886_v14, 0.0  ;;  %v956_v29 = vmax.f32 %v939_v15, 0.0 }
 0x3c4   : > { %v957_v26 = vmax.f32 %v888_v18, 0.0  ;;  %v959_v27 = vmax.f32 %v941_v19, 0.0 }
 0x3c5   : > { %v958_v30 = vmax.f32 %v890_v22, 0.0  ;;  %v960_v31 = vmax.f32 %v943_v23, 0.0 }
 0x3c6   : > { %v965_v32 = vpack.c.bf16 %v957_v26, %v953_v24  ;;  %v967_v33 = vpack.c.bf16 %v959_v27, %v955_v25 }
 0x3c7   : > { %v966_v34 = vpack.c.bf16 %v958_v30, %v954_v28  ;;  %v968_v35 = vpack.c.bf16 %v960_v31, %v956_v29 }
 0x3c9   : > { %986 = vmatprep.subr.bf16.mxu0 %v966_v34  ;;  %1027 = vmatprep.subr.bf16.mxu1 %v968_v35 }
 0x3ca   : > { %987 = vmatpush1.bf16.msra.mxu0 %v965_v32  ;;  %1028 = vmatpush1.bf16.msra.mxu1 %v967_v33 }
 0x3cd   : > { %1215 = vmatmul.mubr.msk.bf16.vlgmr.msra.gmra.mrb[20].mxu0 %vm980_vm7, %v969_v36  ;;  %1216 = vmatmul.mubr.msk.bf16.vlgmr.msra.gmra.mrb[20].mxu1 %vm980_vm7, %v969_v36 }
 0x4a0   : > { %v1018_v45 = vpop.f32.mrb[20].mxu0  ;;  %v1059_v46 = vpop.f32.mrb[20].mxu1 }
 0x4a1   : > { %v1019_v47 = vadd.f32 %v1018_v45, %v979_v44  ;;  %v1060_v48 = vadd.f32 %v1059_v46, %v979_v44  ;;  %v1020_v49 = vpop.f32.mrb[21].mxu0  ;;  %v1061_v50 = vpop.f32.mrb[21].mxu1 }
 0x4a2   : > { %v1021_v52 = vadd.f32 %v1020_v49, %v979_v44  ;;  %v1062_v53 = vadd.f32 %v1061_v50, %v979_v44  ;;  %v1022_v54 = vpop.f32.mrb[22].mxu0  ;;  %v1063_v55 = vpop.f32.mrb[22].mxu1 }
 0x4a3   : > { %v1023_v56 = vpop.f32.mrb[23].mxu0  ;;  %v1064_v57 = vpop.f32.mrb[23].mxu1 }
 0x4a4   : > { %v1070_v58 = vcombine.low %v1019_v47, %v1021_v52  ;;  %v1071_v1 = vcombine.low %v1060_v48, %v1062_v53 }
 0x4a6   : > { %v1078_v59 = vrot.slane %v1070_v58, %v1077_v51  ;;  %v1085_v60 = vrot.slane %v1071_v1, %v1077_v51 }
 0x4a8   : > { %v1086_v61 = vcombine.low %v1078_v59, %v1085_v60 }
 0x4aa   : > { %v1093_v62 = vrot.slane %v1086_v61, %v1077_v51 }
 0x4ac   : > { %1099 = vst.msk [vmem:[%s406_s28] sm:$0xf] %vm1097_vm8, %v1093_v62 }
 0x4ad   : > { %1330 = shalt.err (!%p1327_p2)
}
 0x4ae   : > { %s1331_s13 = scalar_lea.hbm %s1635_s29, 64  ;;  %s1335_s28 = scalar_lea.hbm %s1689_s11, 256 }
 0x4af   : > { %p1332_p4 = scmp.ne.s32.totalorder %s1635_s29, %s1331_s13  ;;  %p1336_p13 = scmp.lt.u32.totalorder %s1635_s29, %s1689_s11 }
 0x4b0   : > { %p1337_p1 = scmp.lt.u32.totalorder %s1335_s28, %s1331_s13  ;;  %p1339_p6 = scmp.lt.u32.totalorder %s1331_s13, %s1635_s29 }
 0x4b1   : > { %p1333_p5 = pnand %p1332_p4, %p1698_p10 }
 0x4b2   : > { %p1338_p3 = por %p1337_p1, %p1336_p13 }
 0x4b3   : > { %p1334_p7 = pneg %p1333_p5 }
 0x4b4   : > { %p1340_p11 = por %p1339_p6, %p1338_p3 }
 0x4b6   : > { %p1341_p12 = pnand %p1340_p11, %p1334_p7 }
 0x4b8   : > { %1344 = shalt.err (!%p1341_p12)
}
 0x4b9   : > { %1226 = dma.vmem_to_hbm [thread:$0]  (%p1698_p10), %s1637_s15, 64, %s1635_s29, %s1101_s18  }
 0x4ba PF: > { %p1237_p8 = scmp.ge.s32.totalorder %s1383_s22, 2  ;;  %s1127_s25 = sand.u32 1, %s1371_s19  }
 0x4bb   : > { %p1699_p9 = scmp.ne.s32.totalorder %s1695_s12, 0  ;;  %s1128_s10 = scalar_lea.sflag [#allocation5], %s1127_s25 }
 0x4bd   : > { %p1233_p0 = pnand %p1237_p8, %p1699_p9 }
 0x4bf   : > { %1366 = dma.done.wait (!%p1233_p0), %s1128_s10, 64  }
 0x4c0   : > { %1368 = vsyncadd (!%p1233_p0), %s1128_s10, 4294967232  ;;  %s1700_s26 = sld [smem:[#allocation9_spill]]  ;;  %p26_p2 = scmp.ge.s32.totalorder %s1481_s24, 6  }
 0x4c1   : > { %s1701_s19 = smov %s1375_s20  ;;  %s1702_s20 = smov %s1379_s21 }
 0x4c2   : > { %s1704_s22 = smov %s1481_s24  ;;  %28 = sbr.rel (!%p26_p2) target bundleno = 8 (0x8), region = 109 }
 0x4c6   : > { %s1703_s21 = smov %s1700_s26 }
 0x4c9   :  { %1133 = vsyncpa [#allocation4], 1 }
 0x4ca   :  { %1135 = vsyncpa [#allocation4 + $0x1], 1 }
 0x4cb   :  { %1136 = vsyncpa [#allocation5], 1 }
 0x4cc   :  { %1138 = vsyncpa [#allocation5 + $0x1], 1 }

</bundles_post_ra>
